<compile_context>
chip_gen: v7x
topology: tpu7x:2x2x1
jax: 0.10.0
libtpu: 0.0.40
codegen_flags: <defaults>
</compile_context>

<pallas_src>
import functools
import math

import jax
import jax.numpy as jnp
import numpy as np
from jax.experimental import pallas as pl
from jax.experimental.pallas import tpu as pltpu

# Fits under v5e/v6e (128 MiB physical) and v7x (64 MiB physical).
_VMEM_LIMIT = 48 * 1024 * 1024


def _qkv_proj_kernel(x_ref, w_ref, qkv_ref):
    # x_ref: (1, C, ts) channels-first tile.  Fold NCHW -> (S, C) transpose
    # here (in-kernel XLU transpose) instead of a wrapper-side HBM pass.
    x_tok = x_ref[0].T                                    # (ts, C), f32
    qkv = jnp.dot(x_tok.astype(w_ref.dtype), w_ref[...],  # bf16 operands
                  preferred_element_type=jnp.float32)     # (ts, 3C), f32 acc
    qkv_ref[0] = qkv.astype(qkv_ref.dtype)


def _flash_attn_kernel(q_ref, k_ref, v_ref, wo_ref, bo_ref, xres_ref, o_ref,
                       m_s, l_s, acc_s, ctx_s,
                       *, heads, head_dim, scale, inv_rescale, residual):
    ki = pl.program_id(2)
    nk = pl.num_programs(2)

    @pl.when(ki == 0)
    def _init():
        m_s[...] = jnp.full(m_s.shape, -jnp.inf, m_s.dtype)
        l_s[...] = jnp.zeros(l_s.shape, l_s.dtype)
        acc_s[...] = jnp.zeros(acc_s.shape, acc_s.dtype)

    # Static head loop; per-head tiles are leading-dim ref slices of the DMA'd
    # block (no masked lane slicing of live values), and all cross-kv-step
    # state lives in VMEM scratch (bounded live ranges / no vreg spill chain).
    for h in range(heads):
        q = q_ref[0, h]                                   # (tq, D) bf16
        k = k_ref[0, h]                                   # (tk, D) bf16
        v = v_ref[0, h]                                   # (tk, D) bf16
        s = jax.lax.dot_general(q, k, (((1,), (1,)), ((), ())),
                                preferred_element_type=jnp.float32) * scale
        m_prev = m_s[h]                                   # (tq, 1)
        m_new = jnp.maximum(m_prev, jnp.max(s, axis=-1, keepdims=True))
        alpha = jnp.exp(m_prev - m_new)                   # f32 softmax math
        p = jnp.exp(s - m_new)                            # (tq, tk) f32
        l_s[h] = alpha * l_s[h] + jnp.sum(p, axis=-1, keepdims=True)
        acc_s[h] = alpha * acc_s[h] + jnp.dot(p.astype(v.dtype), v,
                                              preferred_element_type=jnp.float32)
        m_s[h] = m_new

    @pl.when(ki == nk - 1)
    def _finalize():
        # Assemble per-head contexts into one (tq, C) slab so the output
        # projection is a single K=C matmul (not H small K=head_dim matmuls).
        for h in range(heads):
            inv_l = pl.reciprocal(l_s[h], approx=True)    # EUP reciprocal
            ctx_s[:, h * head_dim:(h + 1) * head_dim] = acc_s[h] * inv_l
        ctx = ctx_s[...].astype(wo_ref.dtype)             # (tq, C) bf16
        out_tok = jnp.dot(ctx, wo_ref[...],
                          preferred_element_type=jnp.float32)   # (tq, C)
        out_tok = out_tok + bo_ref[...]                   # to_out[0] bias
        out_ct = out_tok.T                                # (C, tq): channels-first
        if residual:
            out_ct = out_ct + xres_ref[0].astype(jnp.float32)   # residual (NCHW layout)
        o_ref[0] = (out_ct * inv_rescale).astype(o_ref.dtype)


def null_text_attention_forward(x_nchw, wq, wk, wv, wo, bo, *, heads,
                                residual_connection=True,
                                rescale_output_factor=1.0,
                                seq_tile=128, kv_tile=128):
    """Returns (hidden_states_nchw, null_text_feature)."""
    B, C, Hs, Ws = x_nchw.shape
    S = Hs * Ws
    assert C % heads == 0
    D = C // heads
    assert C % 128 == 0, "inner_dim should be lane-aligned (multiple of 128)"
    assert S % seq_tile == 0 and S % kv_tile == 0
    scale = 1.0 / math.sqrt(D)

    x_ncs = x_nchw.reshape(B, C, S)        # free reshape (no data movement)

    # ---- Kernel A: fused QKV projection (folds input transpose) ----
    wqkv = jnp.concatenate([wq, wk, wv], axis=1).astype(jnp.bfloat16)   # (C, 3C)
    n_s = S // seq_tile
    qkv = pl.pallas_call(
        _qkv_proj_kernel,
        out_shape=jax.ShapeDtypeStruct((B, S, 3 * C), jnp.bfloat16),
        grid_spec=pltpu.PrefetchScalarGridSpec(
            num_scalar_prefetch=0,
            grid=(B, n_s),
            in_specs=[
                pl.BlockSpec((1, C, seq_tile), lambda b, si: (b, 0, si)),
                pl.BlockSpec((C, 3 * C), lambda b, si: (0, 0)),
            ],
            out_specs=pl.BlockSpec((1, seq_tile, 3 * C), lambda b, si: (b, si, 0)),
        ),
        compiler_params=pltpu.CompilerParams(
            dimension_semantics=("parallel", "parallel"),
            vmem_limit_bytes=_VMEM_LIMIT),
    )(x_ncs, wqkv)

    # Split heads: (B, S, 3C) -> 3 x (B, H, S, D).  One bf16 relayout pass so
    # kernel B can head-slice via BlockSpec (DMA) instead of in-kernel lane
    # slicing.  TODO(synk): fold this relayout into kernel A's store as well.
    qkv = qkv.reshape(B, S, 3, heads, D)
    qkv = jnp.transpose(qkv, (2, 0, 3, 1, 4))             # (3, B, H, S, D)
    q, k, v = qkv[0], qkv[1], qkv[2]

    # ---- Kernel B: flash attention + out-proj + residual + rescale ----
    wo_b = wo.astype(jnp.bfloat16)
    bo_f = bo.reshape(1, C).astype(jnp.float32)
    n_q = S // seq_tile
    n_kv = S // kv_tile
    kernel = functools.partial(
        _flash_attn_kernel, heads=heads, head_dim=D, scale=scale,
        inv_rescale=1.0 / rescale_output_factor, residual=residual_connection)

    out_ncs = pl.pallas_call(
        kernel,
        out_shape=jax.ShapeDtypeStruct((B, C, S), x_nchw.dtype),
        grid_spec=pltpu.PrefetchScalarGridSpec(
            num_scalar_prefetch=0,
            grid=(B, n_q, n_kv),
            in_specs=[
                pl.BlockSpec((1, heads, seq_tile, D), lambda b, qi, ki: (b, 0, qi, 0)),  # Q
                pl.BlockSpec((1, heads, kv_tile, D), lambda b, qi, ki: (b, 0, ki, 0)),   # K
                pl.BlockSpec((1, heads, kv_tile, D), lambda b, qi, ki: (b, 0, ki, 0)),   # V
                pl.BlockSpec((C, C), lambda b, qi, ki: (0, 0)),                          # Wo^T
                pl.BlockSpec((1, C), lambda b, qi, ki: (0, 0)),                          # bias
                pl.BlockSpec((1, C, seq_tile), lambda b, qi, ki: (b, 0, qi)),            # residual
            ],
            out_specs=pl.BlockSpec((1, C, seq_tile), lambda b, qi, ki: (b, 0, qi)),
            scratch_shapes=[
                pltpu.VMEM((heads, seq_tile, 1), jnp.float32),   # running max
                pltpu.VMEM((heads, seq_tile, 1), jnp.float32),   # running sum
                pltpu.VMEM((heads, seq_tile, D), jnp.float32),   # running context
                pltpu.VMEM((seq_tile, C), jnp.float32),          # context slab
            ],
        ),
        compiler_params=pltpu.CompilerParams(
            dimension_semantics=("parallel", "parallel", "arbitrary"),
            vmem_limit_bytes=_VMEM_LIMIT),
    )(q, k, v, wo_b, bo_f, x_ncs)

    out_nchw = out_ncs.reshape(B, C, Hs, Ws)
    # register_buffer('null_text_feature', hidden_states.mean(dim=[0,1], keepdim=True))
    null_text_feature = jnp.mean(out_nchw, axis=(0, 1), keepdims=True)
    return out_nchw, null_text_feature


def _reference_forward(x_nchw, wq, wk, wv, wo, bo, *, heads,
                       residual_connection=True, rescale_output_factor=1.0):
    """Pure-JAX f32 reference mirroring the PyTorch forward."""
    B, C, Hs, Ws = x_nchw.shape
    S = Hs * Ws
    D = C // heads
    x = jnp.transpose(x_nchw.reshape(B, C, S), (0, 2, 1))          # (B, S, C)
    q = x @ wq
    k = x @ wk
    v = x @ wv
    q = q.reshape(B, S, heads, D).transpose(0, 2, 1, 3)
    k = k.reshape(B, S, heads, D).transpose(0, 2, 1, 3)
    v = v.reshape(B, S, heads, D).transpose(0, 2, 1, 3)
    s = jnp.einsum("bhqd,bhkd->bhqk", q, k) / math.sqrt(D)
    p = jax.nn.softmax(s, axis=-1)
    a = jnp.einsum("bhqk,bhkd->bhqd", p, v)
    a = a.transpose(0, 2, 1, 3).reshape(B, S, C)
    out = a @ wo + bo
    out = jnp.transpose(out, (0, 2, 1)).reshape(B, C, Hs, Ws)
    if residual_connection:
        out = out + x_nchw
    out = out / rescale_output_factor
    return out, jnp.mean(out, axis=(0, 1), keepdims=True)


if __name__ == "__main__":
    B, C, Hs, Ws = 2, 128, 16, 16    # S = 256 tokens, lane-aligned inner_dim
    heads = 4                        # head_dim = 32

    key = jax.random.PRNGKey(0)
    kx, kq, kk, kvk, ko, kb = jax.random.split(key, 6)
    x = jax.random.normal(kx, (B, C, Hs, Ws), jnp.float32)
    # Linear weights stored as (in, out) == PyTorch weight transposed.
    wq = 0.05 * jax.random.normal(kq, (C, C), jnp.float32)
    wk = 0.05 * jax.random.normal(kk, (C, C), jnp.float32)
    wv = 0.05 * jax.random.normal(kvk, (C, C), jnp.float32)
    wo = 0.05 * jax.random.normal(ko, (C, C), jnp.float32)
    bo = 0.05 * jax.random.normal(kb, (1, C), jnp.float32)

    out, null_feat = null_text_attention_forward(
        x, wq, wk, wv, wo, bo, heads=heads,
        residual_connection=True, rescale_output_factor=1.0)
    jax.block_until_ready(out)
    jax.block_until_ready(null_feat)

    ref_out, ref_null = _reference_forward(
        x, wq, wk, wv, wo, bo, heads=heads,
        residual_connection=True, rescale_output_factor=1.0)

    # bf16 MXU operands (f32 accumulation) -> relaxed tolerance vs f32 reference.
    np.testing.assert_allclose(np.asarray(out), np.asarray(ref_out),
                               rtol=5e-2, atol=5e-2)
    np.testing.assert_allclose(np.asarray(null_feat), np.asarray(ref_null),
                               rtol=5e-2, atol=5e-2)
    assert null_feat.shape == (1, 1, Hs, Ws)

    print("KERNEL_OK")
</pallas_src>

<mosaic_0001>
module attributes {stable_mosaic.version = 11 : i64} {
  func.func @_qkv_proj_kernel(%arg0: i32, %arg1: i32, %arg2: memref<1x128x128xf32, #tpu.memory_space<vmem>>, %arg3: memref<128x384xbf16, #tpu.memory_space<vmem>>, %arg4: memref<1x128x384xbf16, #tpu.memory_space<vmem>>) attributes {dimension_semantics = [#tpu.dimension_semantics<parallel>, #tpu.dimension_semantics<parallel>], iteration_bounds = array<i64: 2, 2>, scalar_prefetch = 0 : i64, scratch_operands = 0 : i64, tpu.core_type = #tpu.core_type<tc>, window_params = [{transform_indices = @transform_0, window_bounds = array<i64: 1, 128, 128>}, {pipeline_mode = #tpu.pipeline_mode<synchronous>, transform_indices = @transform_1, window_bounds = array<i64: 128, 384>}, {transform_indices = @transform_2, window_bounds = array<i64: 1, 128, 384>}]} {
    %c0 = arith.constant 0 : index
    %c0_0 = arith.constant 0 : index
    %c0_1 = arith.constant 0 : index
    %0 = vector.load %arg2[%c0, %c0_0, %c0_1] : memref<1x128x128xf32, #tpu.memory_space<vmem>>, vector<1x128x128xf32>
    %1 = vector.shape_cast %0 : vector<1x128x128xf32> to vector<128x128xf32>
    %2 = tpu.transpose %1, [1, 0] : vector<128x128xf32> -> vector<128x128xf32>
    %3 = arith.truncf %2 : vector<128x128xf32> to vector<128x128xbf16>
    %c0_2 = arith.constant 0 : index
    %c0_3 = arith.constant 0 : index
    %4 = vector.load %arg3[%c0_2, %c0_3] : memref<128x384xbf16, #tpu.memory_space<vmem>>, vector<128x384xbf16>
    %cst = arith.constant dense<0.000000e+00> : vector<128x384xf32>
    %5 = tpu.matmul %3, %4, %cst {dimension_numbers = #tpu.dot_dimension_numbers<[1], [0], [0], [1], [0, 0, 1, 1], [], []>} : vector<128x128xbf16>, vector<128x384xbf16>, vector<128x384xf32> -> vector<128x384xf32>
    %6 = arith.truncf %5 : vector<128x384xf32> to vector<128x384xbf16>
    %c0_4 = arith.constant 0 : index
    %c0_5 = arith.constant 0 : index
    %c0_6 = arith.constant 0 : index
    %7 = vector.load %arg4[%c0_4, %c0_5, %c0_6] : memref<1x128x384xbf16, #tpu.memory_space<vmem>>, vector<1x128x384xbf16>
    %8 = vector.shape_cast %7 : vector<1x128x384xbf16> to vector<128x384xbf16>
    %9 = vector.shape_cast %6 : vector<128x384xbf16> to vector<1x128x384xbf16>
    tpu.vector_store %arg4[%c0_4, %c0_5, %c0_6], %9 {strides = array<i32>} : memref<1x128x384xbf16, #tpu.memory_space<vmem>>, vector<1x128x384xbf16>,
    return
  }
  func.func @transform_0(%arg0: i32, %arg1: i32) -> (i32, i32, i32) {
    %c0_i32 = arith.constant 0 : i32
    %c0_i32_0 = arith.constant 0 : i32
    return %arg0, %c0_i32, %arg1 : i32, i32, i32
  }
  func.func @transform_1(%arg0: i32, %arg1: i32) -> (i32, i32) {
    %c0_i32 = arith.constant 0 : i32
    %c0_i32_0 = arith.constant 0 : i32
    %c0_i32_1 = arith.constant 0 : i32
    return %c0_i32, %c0_i32_0 : i32, i32
  }
  func.func @transform_2(%arg0: i32, %arg1: i32) -> (i32, i32, i32) {
    %c0_i32 = arith.constant 0 : i32
    %c0_i32_0 = arith.constant 0 : i32
    return %arg0, %arg1, %c0_i32 : i32, i32, i32
  }
}

</mosaic_0001>

<bundles_post_ra>
// kernel: tpu_custom_call.1
= control target key start
LH: loop header
LB: loop body
LE: loop exit
PB: predicated region body
PF: predicated region fallthrough
CT: control target
= control target key end

     0   :  { %s1701_s0 = inlined_call_operand.hbm [shape: f32[2,128,256], index: 0, kind: input, shape index: {}]   ;;  %s1702_s1 = inlined_call_operand.hbm [shape: bf16[128,384], index: 1, kind: input, shape index: {}]   ;;  %s1703_s2 = inlined_call_operand.hbm [shape: bf16[2,256,384], index: 2, kind: output, shape index: {}]  }
   0x1   :  { %1711 = sst [smem:[#allocation12_spill]] %s1702_s1 }
   0x2   :  { %7 = vsyncpa [#allocation3], 0 }
   0x3   :  { %9 = vsyncpa [#allocation3 + $0x1], 0 }
   0x4   :  { %10 = vsyncpa [#allocation6], 0 }
   0x5   :  { %11 = vsyncpa [#allocation4], 0 }
   0x6   :  { %13 = vsyncpa [#allocation4 + $0x1], 0  ;;  %s1402_s9 = smov 0   ;;  %s1404_s10 = smov 0  }
   0x7   :  { %s1406_s11 = smov 0   ;;  %s1408_s12 = smov 0  }
   0x8   :  { %s1410_s13 = smov 0   ;;  %s1412_s14 = smov 0  }
   0x9   :  { %s1414_s15 = smov 0   ;;  %s1416_s16 = smov 0  }
   0xa LB: > { %s930_s17 = sadd.s32 4294967295, %s1374_s16   ;;  %s931_s18 = sadd.s32 4294967294, %s1374_s16   ;;  %s1374_s16 = sphi %s1416_s16, %s19_s16   ;;  %s1370_s15 = sphi %s1414_s15, %s1736_s15   ;;  %s1366_s14 = sphi %s1412_s14, %s1735_s14   ;;  %s1362_s13 = sphi %s1410_s13, %s1734_s13   ;;  %s1358_s12 = sphi %s1408_s12, %s1733_s12   ;;  %s1354_s11 = sphi %s1406_s11, %s1732_s11   ;;  %s1350_s10 = sphi %s1404_s10, %s1731_s10   ;;  %s1346_s9 = sphi %s1402_s9, %s1730_s9  }
   0xb   : > { %p47_p0 = scmp.ne.s32.totalorder %s1354_s11, %s1350_s10  ;;  %p48_p1 = scmp.eq.s32.totalorder %s1374_s16, 0 }
   0xc   : > { %p53_p2 = scmp.ne.s32.totalorder %s1350_s10, %s1346_s9  ;;  %p1450_p3 = scmp.eq.s32.totalorder %s930_s17, 0 }
   0xd   : > { %p100_p4 = scmp.eq.s32.totalorder %s930_s17, 3  ;;  %p1454_p5 = por %p48_p1, %p47_p0 }
   0xe   : > { %s1712_s20 = scalar_select %p1450_p3, 1, 0 }
   0xf   : > { %p106_p6 = scmp.eq.s32.totalorder %s931_s18, 3  ;;  %p1460_p7 = por %p1450_p3, %p53_p2 }
  0x10   : > { %p1464_p8 = por %p100_p4, %p47_p0  ;;  %p932_p10 = scmp.ge.s32.totalorder %s1374_s16, 1 }
  0x11   : > { %s1714_s22 = scalar_select %p1460_p7, 1, 0 }
  0x12   : > { %s1715_s23 = scalar_select %p1464_p8, 1, 0 }
  0x13   : > { %p1468_p9 = por %p106_p6, %p53_p2  ;;  %p113_p11 = scmp.lt.s32.totalorder %s1374_s16, 5 }
  0x14   : > { %s1376_s26 = smov [#allocation5]   ;;  %p1106_p0 = scmp.lt.s32.totalorder %s1374_s16, 4 }
  0x15   : > { %s1716_s24 = scalar_select %p1468_p9, 1, 0 }
  0x16   : > { %p1474_p12 = pnand %p932_p10, %p113_p11  ;;  %s125_s27 = sshll.u32 %s1376_s26, 4  ;;  %s126_s27 = int_to_ptr.vmem [resolvable:$true] %s125_s27 }
  0x17   : > { %p1489_p2 = pnand %p1106_p0, %p1454_p5  ;;  %s1720_s1 = sld [smem:[#allocation12_spill]] }
  0x18   : > { %s1717_s25 = scalar_select %p1474_p12, 1, 0 }
  0x19   : > { %p1093_p13 = pneg %p1474_p12 }
  0x1a   : > { %s1719_s29 = scalar_select %p1489_p2, 1, 0 }
  0x1b   : > { %p1483_p1 = pnand %p1093_p13, %p1450_p3 }
  0x1d   : > { %s1214_s4 = scalar_lea.hbm %s1720_s1, 3072  ;;  %p1216_p6 = pneg %p1483_p1 }
  0x1e   : > { %p1215_p4 = scmp.ne.s32.totalorder %s1720_s1, %s1214_s4  ;;  %p1221_p13 = scmp.lt.u32.totalorder %s1214_s4, %s1720_s1 }
  0x20   : > { %p1217_p10 = pnand %p1216_p6, %p1215_p4 }
  0x22   : > { %p1218_p11 = pneg %p1217_p10 }
  0x24   : > { %p1223_p5 = pnand %p1221_p13, %p1218_p11 }
  0x26   : > { %1226 = shalt.err (!%p1223_p5)
}
  0x27   : > { %s1227_s17 = scalar_lea.vmem %s126_s27, 3072  ;;  %p1235_p3 = scmp.lt.s32.totalorder %s126_s27, %s126_s27 }
  0x28   : > { %p1228_p0 = scmp.ne.s32.totalorder %s126_s27, %s1227_s17  ;;  %p1236_p7 = scmp.lt.s32.totalorder %s1227_s17, %s1227_s17 }
  0x2a   : > { %p1230_p9 = pnand %p1228_p0, %p1216_p6  ;;  %p1237_p12 = por %p1236_p7, %p1235_p3 }
  0x2c   : > { %p1231_p8 = pneg %p1230_p9 }
  0x2e   : > { %p1238_p2 = pnand %p1237_p12, %p1231_p8 }
  0x30   : > { %1241 = shalt.err (!%p1238_p2)
}
  0x31   : > { %s1377_s18 = smov 192   ;;  %s1378_s21 = smov 12  }
  0x32   : > { %1096 = dma.hbm_to_vmem [thread:$0]  (!%p1483_p1), %s1720_s1, 3072, %s126_s27, [#allocation6], %s1377_s18, %s1377_s18, %s1378_s21  }
  0x33   : > { %s28_s3 = sadd.s32 1, %s1366_s14  ;;  %s31_s4 = sadd.s32 1, %s1370_s15 }
  0x34   : > { %p29_p3 = scmp.ge.s32.totalorder %s28_s3, 2  ;;  %s139_s5 = sand.u32 1, %s1354_s11  }
  0x35   : > { %s936_s6 = sshll.u32 %s1370_s15, 5  ;;  %s935_s28 = sshll.u32 %s139_s5, 7 }
  0x36   : > { %s1738_s3 = smov (%p29_p3, %s28_s3), 0  ;;  %s1740_s4 = smov (!%p29_p3, %s31_s4), %s1370_s15 }
  0x37   : > { %1721 = sst [smem:[#allocation11_spill]] %s1738_s3  ;;  %s36_s7 = ssub.s32 %s1366_s14, %s1738_s3 }
  0x38   : > { %p33_p7 = scmp.ge.s32.totalorder %s1740_s4, 2  ;;  %s148_s8 = sadd.s32 %s1366_s14, %s936_s6 }
  0x39   : > { %s937_s27 = sshll.u32 %s148_s8, 7  ;;  %s143_s17 = scalar_lea.vmem [#allocation2], %s935_s28 }
  0x3a   : > { %s1742_s4 = smov (%p33_p7, %s1740_s4), 0  ;;  %s151_s18 = sshll.u32 %s143_s17, 4  ;;  %s1528_s18 = int_to_ptr.vmem [resolvable:$true] %s151_s18 }
  0x3b   : > { %s35_s21 = ssub.s32 %s1370_s15, %s1742_s4  ;;  %s1526_s19 = scalar_lea.hbm %s1701_s0, %s937_s27 }
  0x3c   : > { %s37_s1 = sor.u32 %s36_s7, %s35_s21  ;;  %s1722_s6 = sadd.s32 1, %s1354_s11 }
  0x3d   : > { %p38_p8 = scmp.eq.s32.totalorder %s37_s1, 0  ;;  %s1535_s8 = scalar_lea.sflag [#allocation3], %s139_s5 }
  0x3e   : > { %s1242_s28 = scalar_lea.hbm %s1526_s19, 2048  ;;  %p1723_p12 = scmp.ne.s32.totalorder %s1719_s29, 0 }
  0x3f   : > { %s1533_s3 = scalar_select %p38_p8, %s1354_s11, %s1722_s6  }
  0x40   : > { %p1243_p9 = scmp.ne.s32.totalorder %s1526_s19, %s1242_s28  ;;  %p1244_p1 = pneg %p1723_p12 }
  0x41   : > { %s1247_s7 = scalar_lea.hbm %s1701_s0, 8192  ;;  %p1248_p6 = scmp.lt.u32.totalorder %s1526_s19, %s1701_s0 }
  0x42   : > { %p1245_p2 = pnand %p1244_p1, %p1243_p9  ;;  %p1249_p10 = scmp.lt.u32.totalorder %s1247_s7, %s1242_s28 }
  0x43   : > { %p1251_p13 = scmp.lt.u32.totalorder %s1242_s28, %s1526_s19 }
  0x44   : > { %p1246_p4 = pneg %p1245_p2  ;;  %p1250_p11 = por %p1249_p10, %p1248_p6 }
  0x46   : > { %p1252_p5 = por %p1251_p13, %p1250_p11 }
  0x48   : > { %p1253_p0 = pnand %p1252_p5, %p1246_p4 }
  0x4a   : > { %1256 = shalt.err (!%p1253_p0)
}
  0x4b   : > { %s1257_s1 = scalar_lea.vmem %s1528_s18, 2048  ;;  %s1379_s5 = smov [#allocation2]  }
  0x4c   : > { %p1258_p3 = scmp.ne.s32.totalorder %s1528_s18, %s1257_s1  ;;  %s1262_s30 = sshll.u32 %s1379_s5, 4  ;;  %s1263_s30 = int_to_ptr.vmem [resolvable:$false] %s1262_s30 }
  0x4d   : > { %s1264_s6 = scalar_lea.vmem %s1263_s30, 4096  ;;  %p1265_p9 = scmp.lt.s32.totalorder %s1528_s18, %s1263_s30 }
  0x4e   : > { %p1260_p7 = pnand %p1258_p3, %p1244_p1  ;;  %p1266_p2 = scmp.lt.s32.totalorder %s1264_s6, %s1257_s1 }
  0x50   : > { %p1261_p8 = pneg %p1260_p7  ;;  %p1267_p6 = por %p1266_p2, %p1265_p9 }
  0x52   : > { %p1268_p10 = pnand %p1267_p6, %p1261_p8 }
  0x54   : > { %1271 = shalt.err (!%p1268_p10)
}
  0x55   : > { %s1380_s28 = smov 256   ;;  %s1381_s27 = smov 128  }
  0x56   : > { %s1382_s17 = smov 8   ;;  %p1724_p1 = scmp.ne.s32.totalorder %s1717_s25, 0 }
  0x57   : > { %1100 = dma.hbm_to_vmem [thread:$0]  (!%p1723_p12), %s1526_s19, 2048, %s1528_s18, %s1535_s8, %s1380_s28, %s1381_s27, %s1382_s17  }
  0x58   : > { %163 = sbr.rel (%p1724_p1) target bundleno = 523 (0x20b), region = 28  ;;  %s1566_s7 = sand.u32 (!%p1724_p1), 1, %s1350_s10  }
  0x59   : > { %s939_s21 = sshll.u32 (!%p1724_p1), %s1566_s7, 7  ;;  %s166_s26 = scalar_lea.sflag (!%p1724_p1), [#allocation3], %s1566_s7 }
  0x5a   : > { %s1570_s1 = scalar_lea.vmem (!%p1724_p1), [#allocation2], %s939_s21  ;;  %p1725_p4 = scmp.ne.s32.totalorder (!%p1724_p1), %s1714_s22, 0 }
  0x5f   : > { %1333 = dma.done.wait (%p1725_p4), %s166_s26, 2048  }
  0x60   : > { %1335 = vsyncadd (%p1725_p4), %s166_s26, 4294965248  ;;  %p1726_p12 = scmp.ne.s32.totalorder %s1712_s20, 0 }
  0x62   : > { %1337 = dma.done.wait (%p1726_p12), [#allocation6], 3072  }
  0x63   : > { %1339 = vsyncadd (%p1726_p12), [#allocation6], 4294964224  ;;  %v196_v0 = vld [vmem:[%s1570_s1] sm:$0xff]  ;;  %v197_v1 = vld [vmem:[%s1570_s1 + $0x8] sm:$0xff]  ;;  %v1383_v6 = vmov 0   ;;  %s1082_s19 = smul.u32 192, %s1566_s7 }
  0x64   : > { %212 = vxpose.xlu0.b32.start [1/16] %v196_v0, 128  ;;  %v198_v2 = vld [vmem:[%s1570_s1 + $0x10] sm:$0xff]  ;;  %v1184_v4 = vld [vmem:[#allocation5] ss:$12 sps:$4 sm:$0xff]   ;;  %v1185_v5 = vld [vmem:[#allocation5 + $0x1c] ss:$12 sps:$4 sm:$0xff]   ;;  %444 = vmatprep.mubr.bf16.mxu0 %v1383_v6  ;;  %s1083_s22 = smul.u32 48, %s1358_s12 }
  0x65   : > { %v1182_v3 = vld [vmem:[#allocation5 + $0x4] ss:$12 sps:$4 sm:$0xff]   ;;  %v199_v7 = vld [vmem:[%s1570_s1 + $0x18] sm:$0xff]  ;;  %v1190_v9 = vld [vmem:[#allocation5 + $0x8] ss:$12 sps:$4 sm:$0xff]   ;;  %s1605_s20 = scalar_lea.vmem [#allocation7], %s1082_s19 }
  0x66   : > { %412 = vmatprep.subr.bf16.mxu0 %v1182_v3  ;;  %v1187_v8 = vld [vmem:[#allocation5 + $0x18] ss:$12 sps:$4 sm:$0xff]   ;;  %v1188_v10 = vld [vmem:[#allocation5 + $0x34] ss:$12 sps:$4 sm:$0xff]   ;;  %1050 = vmatprep.subr.bf16.mxu1 %v1190_v9  ;;  %v1191_v13 = vld [vmem:[#allocation5 + $0x30] ss:$12 sps:$4 sm:$0xff]  }
  0x67   : > { %413 = vmatpush1.bf16.msra.mxu0 %v1184_v4  ;;  %v200_v11 = vld [vmem:[%s1570_s1 + $0x20] sm:$0xff]  ;;  %1051 = vmatpush3.bf16.msra.mxu1 %v1190_v9  ;;  %v1192_v14 = vld [vmem:[#allocation5 + $0x4c] ss:$12 sps:$4 sm:$0xff]   ;;  %v1195_v17 = vld [vmem:[#allocation5 + $0x48] ss:$12 sps:$4 sm:$0xff]   ;;  %s1084_s25 = smul.u32 96, %s1362_s13 }
  0x68   : > { %213 = vxpose.xlu0.b32.cont [2/16] %v197_v1, 128  ;;  %414 = vmatprep.subr.bf16.mxu0 %v1185_v5  ;;  %v1194_v12 = vld [vmem:[#allocation5 + $0x20] ss:$12 sps:$4 sm:$0xff]   ;;  %v1198_v15 = vld [vmem:[#allocation5 + $0x38] ss:$12 sps:$4 sm:$0xff]   ;;  %v1202_v19 = vld [vmem:[#allocation5 + $0x50] ss:$12 sps:$4 sm:$0xff]  }
  0x69   : > { %1052 = vmatprep.subr.bf16.mxu1 %v1194_v12  ;;  %v201_v16 = vld [vmem:[%s1570_s1 + $0x28] sm:$0xff]  ;;  %v1196_v18 = vld [vmem:[#allocation5 + $0x64] ss:$12 sps:$4 sm:$0xff]   ;;  %v203_v25 = vld [vmem:[%s1570_s1 + $0x38] sm:$0xff]  ;;  %s828_s29 = sadd.s32 %s1084_s25, %s1083_s22  ;;  %s831_s8 = sshll.u32 %s1605_s20, 4  ;;  %s1642_s8 = int_to_ptr.vmem [resolvable:$true] %s831_s8 }
  0x6a   : > { %v202_v20 = vld [vmem:[%s1570_s1 + $0x30] sm:$0xff]  ;;  %v1199_v21 = vld [vmem:[#allocation5 + $0x60] ss:$12 sps:$4 sm:$0xff]   ;;  %v1200_v22 = vld [vmem:[#allocation5 + $0x7c] ss:$12 sps:$4 sm:$0xff]   ;;  %s999_s18 = sshll.u32 %s828_s29, 6 }
  0x6b   : > { %415 = vmatpush1.bf16.msra.mxu0 %v1187_v8  ;;  %1053 = vmatpush3.bf16.msra.mxu1 %v1194_v12  ;;  %v1206_v23 = vld [vmem:[#allocation5 + $0x68] ss:$12 sps:$4 sm:$0xff]   ;;  %v1203_v24 = vld [vmem:[#allocation5 + $0x78] ss:$12 sps:$4 sm:$0xff]   ;;  %v1210_v27 = vld [vmem:[#allocation5 + $0x80] ss:$12 sps:$4 sm:$0xff]   ;;  %s1640_s5 = scalar_lea.hbm %s1703_s2, %s999_s18 }
  0x6c   : > { %214 = vxpose.xlu0.b32.cont [3/16] %v198_v2, 128  ;;  %416 = vmatprep.subr.bf16.mxu0 %v1188_v10  ;;  %v1204_v26 = vld [vmem:[#allocation5 + $0x94] ss:$12 sps:$4 sm:$0xff]   ;;  %v1207_v28 = vld [vmem:[#allocation5 + $0x90] ss:$12 sps:$4 sm:$0xff]   ;;  %v1208_v30 = vld [vmem:[#allocation5 + $0xac] ss:$12 sps:$4 sm:$0xff]  }
  0x6d   : > { %1054 = vmatprep.subr.bf16.mxu1 %v1198_v15  ;;  %v204_v29 = vld [vmem:[%s1570_s1 + $0x40] sm:$0xff]  ;;  %v1211_v32 = vld [vmem:[#allocation5 + $0xa8] ss:$12 sps:$4 sm:$0xff]   ;;  %v1213_v34 = vld [vmem:[#allocation5 + $0xb0] ss:$12 sps:$4 sm:$0xff]   ;;  %s815_s30 = scalar_lea.sflag [#allocation4], %s1566_s7 }
  0x6e   : > { %v1212_v31 = vld [vmem:[#allocation5 + $0x98] ss:$12 sps:$4 sm:$0xff]   ;;  %v205_v33 = vld [vmem:[%s1570_s1 + $0x48] sm:$0xff]  ;;  %v206_v35 = vld [vmem:[%s1570_s1 + $0x50] sm:$0xff]  ;;  %s1272_s6 = scalar_lea.vmem %s1642_s8, 3072  ;;  %p1727_p13 = scmp.ne.s32.totalorder %s1715_s23, 0 }
  0x6f   : > { %417 = vmatpush1.bf16.msra.mxu0 %v1191_v13  ;;  %1055 = vmatpush3.bf16.msra.mxu1 %v1198_v15  ;;  %v207_v36 = vld [vmem:[%s1570_s1 + $0x58] sm:$0xff]  ;;  %v208_v37 = vld [vmem:[%s1570_s1 + $0x60] sm:$0xff]  ;;  %v209_v38 = vld [vmem:[%s1570_s1 + $0x68] sm:$0xff]  ;;  %p1273_p11 = scmp.ne.s32.totalorder %s1642_s8, %s1272_s6  ;;  %s1384_s28 = smov [#allocation7]  }
  0x70   : > { %215 = vxpose.xlu0.b32.cont [4/16] %v199_v7, 128  ;;  %418 = vmatprep.subr.bf16.mxu0 %v1192_v14  ;;  %v210_v39 = vld [vmem:[%s1570_s1 + $0x70] sm:$0xff]  ;;  %v211_v40 = vld [vmem:[%s1570_s1 + $0x78] sm:$0xff]  ;;  %s1276_s27 = sshll.u32 %s1384_s28, 4  ;;  %s1277_s27 = int_to_ptr.vmem [resolvable:$false] %s1276_s27 }
  0x71   : > { %1056 = vmatprep.subr.bf16.mxu1 %v1202_v19  ;;  %p1274_p5 = pnand %p1273_p11, %p1727_p13  ;;  %s1278_s17 = scalar_lea.vmem %s1277_s27, 6144 }
  0x72   : > { %p1279_p3 = scmp.lt.s32.totalorder %s1642_s8, %s1277_s27  ;;  %p1280_p7 = scmp.lt.s32.totalorder %s1278_s17, %s1272_s6 }
  0x73   : > { %419 = vmatpush1.bf16.msra.mxu0 %v1195_v17  ;;  %1057 = vmatpush3.bf16.msra.mxu1 %v1202_v19  ;;  %p1275_p0 = pneg %p1274_p5 }
  0x74   : > { %216 = vxpose.xlu0.b32.cont [5/16] %v200_v11, 128  ;;  %420 = vmatprep.subr.bf16.mxu0 %v1196_v18  ;;  %p1281_p8 = por %p1280_p7, %p1279_p3 }
  0x75   : > { %1058 = vmatprep.subr.bf16.mxu1 %v1206_v23 }
  0x76   : > { %p1282_p9 = pnand %p1281_p8, %p1275_p0 }
  0x77   : > { %421 = vmatpush1.bf16.msra.mxu0 %v1199_v21  ;;  %1059 = vmatpush3.bf16.msra.mxu1 %v1206_v23 }
  0x78   : > { %217 = vxpose.xlu0.b32.cont [6/16] %v201_v16, 128  ;;  %422 = vmatprep.subr.bf16.mxu0 %v1200_v22 }
  0x79   : > { %1060 = vmatprep.subr.bf16.mxu1 %v1210_v27 }
  0x7b   : > { %423 = vmatpush1.bf16.msra.mxu0 %v1203_v24  ;;  %1061 = vmatpush3.bf16.msra.mxu1 %v1210_v27 }
  0x7c   : > { %218 = vxpose.xlu0.b32.cont [7/16] %v202_v20, 128  ;;  %424 = vmatprep.subr.bf16.mxu0 %v1204_v26 }
  0x7d   : > { %1062 = vmatprep.subr.bf16.mxu1 %v1212_v31 }
  0x7f   : > { %425 = vmatpush1.bf16.msra.mxu0 %v1207_v28  ;;  %1063 = vmatpush3.bf16.msra.mxu1 %v1212_v31 }
  0x80   : > { %219 = vxpose.xlu0.b32.cont [8/16] %v203_v25, 128  ;;  %426 = vmatprep.subr.bf16.mxu0 %v1208_v30 }
  0x81   : > { %1064 = vmatprep.subr.bf16.mxu1 %v1213_v34 }
  0x83   : > { %427 = vmatpush1.bf16.msra.mxu0 %v1211_v32  ;;  %1065 = vmatpush3.bf16.msra.mxu1 %v1213_v34 }
  0x84   : > { %220 = vxpose.xlu0.b32.cont [9/16] %v204_v29, 128 }
  0x88   : > { %221 = vxpose.xlu0.b32.cont [10/16] %v205_v33, 128 }
  0x8c   : > { %222 = vxpose.xlu0.b32.cont [11/16] %v206_v35, 128 }
  0x90   : > { %223 = vxpose.xlu0.b32.cont [12/16] %v207_v36, 128 }
  0x94   : > { %224 = vxpose.xlu0.b32.cont [13/16] %v208_v37, 128 }
  0x98   : > { %225 = vxpose.xlu0.b32.cont [14/16] %v209_v38, 128 }
  0x9c   : > { %226 = vxpose.xlu0.b32.cont [15/16] %v210_v39, 128 }
  0xa0   : > { %227 = vxpose.xlu0.b32.end [16/16] %v211_v40, 128 }
  0xe4   : > { %v228_v41 = vpop.trf.xlu0 }
  0xe8   : > { %v229_v42 = vpop.trf.xlu0 }
  0xe9   : > { %v244_v43 = vpack.c.bf16 %v229_v42, %v228_v41 }
  0xeb   : > { %445 = vmatmul.mubr.bf16.vlgmr.msra.gmra.mrb[0].mxu0 %v244_v43  ;;  %1066 = vmatprep.mubr.bf16.mxu1 %v244_v43 }
  0xec   : > { %v230_v44 = vpop.trf.xlu0  ;;  %454 = vmatprep.mubr.bf16.mxu0 %v1383_v6 }
  0xf0   : > { %v231_v45 = vpop.trf.xlu0 }
  0xf1   : > { %v245_v46 = vpack.c.bf16 %v231_v45, %v230_v44 }
  0xf3   : > { %455 = vmatmul.mubr.bf16.gmra.mrb[4].mxu0 %v245_v46  ;;  %1067 = vmatmul.mubr.bf16.vlgmr.msra.gmra.mrb[0].mxu1 %v245_v46 }
  0xf4   : > { %v232_v47 = vpop.trf.xlu0  ;;  %464 = vmatprep.mubr.bf16.mxu0 %v1383_v6 }
  0xf8   : > { %v233_v48 = vpop.trf.xlu0 }
  0xf9   : > { %v246_v49 = vpack.c.bf16 %v233_v48, %v232_v47 }
  0xfb   : > { %465 = vmatmul.mubr.bf16.gmra.mrb[8].mxu0 %v246_v49  ;;  %1070 = vmatprep.mubr.bf16.mxu1 %v246_v49 }
  0xfc   : > { %v234_v50 = vpop.trf.xlu0  ;;  %474 = vmatprep.mubr.bf16.mxu0 %v1383_v6 }
 0x100   : > { %v235_v51 = vpop.trf.xlu0 }
 0x101   : > { %v247_v52 = vpack.c.bf16 %v235_v51, %v234_v50 }
 0x103   : > { %475 = vmatmul.mubr.bf16.gmra.mrb[12].mxu0 %v247_v52  ;;  %1071 = vmatmul.mubr.bf16.gmra.mrb[4].mxu1 %v247_v52 }
 0x104   : > { %v236_v53 = vpop.trf.xlu0  ;;  %484 = vmatprep.mubr.bf16.mxu0 %v1383_v6 }
 0x108   : > { %v237_v54 = vpop.trf.xlu0 }
 0x109   : > { %v248_v55 = vpack.c.bf16 %v237_v54, %v236_v53 }
 0x10b   : > { %485 = vmatmul.mubr.bf16.gmra.mrb[16].mxu0 %v248_v55  ;;  %1074 = vmatprep.mubr.bf16.mxu1 %v248_v55 }
 0x10c   : > { %v238_v56 = vpop.trf.xlu0  ;;  %494 = vmatprep.mubr.bf16.mxu0 %v1383_v6 }
 0x110   : > { %v239_v57 = vpop.trf.xlu0 }
 0x111   : > { %v249_v58 = vpack.c.bf16 %v239_v57, %v238_v56 }
 0x113   : > { %495 = vmatmul.mubr.bf16.gmra.mrb[20].mxu0 %v249_v58  ;;  %1075 = vmatmul.mubr.bf16.gmra.mrb[8].mxu1 %v249_v58 }
 0x114   : > { %v240_v59 = vpop.trf.xlu0  ;;  %504 = vmatprep.mubr.bf16.mxu0 %v1383_v6 }
 0x118   : > { %v241_v60 = vpop.trf.xlu0 }
 0x119   : > { %v250_v61 = vpack.c.bf16 %v241_v60, %v240_v59 }
 0x11b   : > { %505 = vmatmul.mubr.bf16.gmra.mrb[24].mxu0 %v250_v61  ;;  %1078 = vmatprep.mubr.bf16.mxu1 %v250_v61 }
 0x11c   : > { %v242_v62 = vpop.trf.xlu0  ;;  %514 = vmatprep.mubr.bf16.mxu0 %v1383_v6 }
 0x120   : > { %v243_v63 = vpop.trf.xlu0 }
 0x121   : > { %v251_v0 = vpack.c.bf16 %v243_v63, %v242_v62 }
 0x123   : > { %515 = vmatmul.mubr.bf16.gmra.mrb[28].mxu0 %v251_v0  ;;  %1079 = vmatmul.mubr.bf16.gmra.mrb[12].mxu1 %v251_v0 }
 0x1be   : > { %v446_v1 = vpop.f32.mrb[0].mxu0 }
 0x1bf   : > { %v448_v2 = vpop.f32.mrb[1].mxu0 }
 0x1c0   : > { %v1002_v3 = vpack.c.bf16 %v448_v2, %v446_v1  ;;  %v450_v4 = vpop.f32.mrb[2].mxu0 }
 0x1c1   : > { %v452_v5 = vpop.f32.mrb[3].mxu0 }
 0x1c2   : > { %782 = vst [vmem:[%s1605_s20] sm:$0xff] %v1002_v3  ;;  %v1004_v7 = vpack.c.bf16 %v452_v5, %v450_v4 }
 0x1c4   : > { %784 = vst [vmem:[%s1605_s20 + $0xc] sm:$0xff] %v1004_v7 }
 0x1c6   : > { %v456_v6 = vpop.f32.mrb[4].mxu0  ;;  %v1068_v8 = vpop.f32.mrb[0].mxu1 }
 0x1c7   : > { %v1007_v9 = vpack.c.bf16 %v1068_v8, %v1068_v8  ;;  %v458_v10 = vpop.f32.mrb[5].mxu0  ;;  %v559_v11 = vpop.f32.mrb[1].mxu1 }
 0x1c8   : > { %v1006_v12 = vpack.c.bf16 %v458_v10, %v456_v6  ;;  %v1003_v13 = vpack.c.bf16 %v559_v11, %v559_v11  ;;  %v460_v14 = vpop.f32.mrb[6].mxu0  ;;  %v1069_v15 = vpop.f32.mrb[2].mxu1 }
 0x1c9   : > { %787 = vst [vmem:[%s1605_s20 + $0x20] sm:$0xf] %v1007_v9  ;;  %v1009_v16 = vpack.c.bf16 %v1069_v15, %v1069_v15  ;;  %v462_v17 = vpop.f32.mrb[7].mxu0  ;;  %v562_v18 = vpop.f32.mrb[3].mxu1 }
 0x1ca   : > { %786 = vst [vmem:[%s1605_s20 + $0x18] sm:$0xff] %v1006_v12  ;;  %783 = vst [vmem:[%s1605_s20 + $0x8] sm:$0xf] %v1003_v13  ;;  %v1008_v19 = vpack.c.bf16 %v462_v17, %v460_v14  ;;  %v1005_v20 = vpack.c.bf16 %v562_v18, %v562_v18 }
 0x1cb   : > { %789 = vst [vmem:[%s1605_s20 + $0x2c] sm:$0xf] %v1009_v16 }
 0x1cc   : > { %788 = vst [vmem:[%s1605_s20 + $0x24] sm:$0xff] %v1008_v19  ;;  %785 = vst [vmem:[%s1605_s20 + $0x14] sm:$0xf] %v1005_v20 }
 0x1ce   : > { %v466_v21 = vpop.f32.mrb[8].mxu0 }
 0x1cf   : > { %v468_v22 = vpop.f32.mrb[9].mxu0 }
 0x1d0   : > { %v1010_v23 = vpack.c.bf16 %v468_v22, %v466_v21  ;;  %v470_v24 = vpop.f32.mrb[10].mxu0 }
 0x1d1   : > { %v472_v25 = vpop.f32.mrb[11].mxu0 }
 0x1d2   : > { %790 = vst [vmem:[%s1605_s20 + $0x30] sm:$0xff] %v1010_v23  ;;  %v1012_v26 = vpack.c.bf16 %v472_v25, %v470_v24 }
 0x1d4   : > { %792 = vst [vmem:[%s1605_s20 + $0x3c] sm:$0xff] %v1012_v26 }
 0x1d6   : > { %v476_v27 = vpop.f32.mrb[12].mxu0  ;;  %v1072_v28 = vpop.f32.mrb[4].mxu1 }
 0x1d7   : > { %v1015_v29 = vpack.c.bf16 %v1072_v28, %v1072_v28  ;;  %v478_v30 = vpop.f32.mrb[13].mxu0  ;;  %v575_v31 = vpop.f32.mrb[5].mxu1 }
 0x1d8   : > { %v1014_v32 = vpack.c.bf16 %v478_v30, %v476_v27  ;;  %v1011_v33 = vpack.c.bf16 %v575_v31, %v575_v31  ;;  %v480_v34 = vpop.f32.mrb[14].mxu0  ;;  %v1073_v35 = vpop.f32.mrb[6].mxu1 }
 0x1d9   : > { %795 = vst [vmem:[%s1605_s20 + $0x50] sm:$0xf] %v1015_v29  ;;  %v1017_v36 = vpack.c.bf16 %v1073_v35, %v1073_v35  ;;  %v482_v37 = vpop.f32.mrb[15].mxu0  ;;  %v578_v38 = vpop.f32.mrb[7].mxu1 }
 0x1da   : > { %794 = vst [vmem:[%s1605_s20 + $0x48] sm:$0xff] %v1014_v32  ;;  %791 = vst [vmem:[%s1605_s20 + $0x38] sm:$0xf] %v1011_v33  ;;  %v1016_v39 = vpack.c.bf16 %v482_v37, %v480_v34  ;;  %v1013_v40 = vpack.c.bf16 %v578_v38, %v578_v38 }
 0x1db   : > { %797 = vst [vmem:[%s1605_s20 + $0x5c] sm:$0xf] %v1017_v36 }
 0x1dc   : > { %796 = vst [vmem:[%s1605_s20 + $0x54] sm:$0xff] %v1016_v39  ;;  %793 = vst [vmem:[%s1605_s20 + $0x44] sm:$0xf] %v1013_v40 }
 0x1de   : > { %v486_v41 = vpop.f32.mrb[16].mxu0 }
 0x1df   : > { %v488_v42 = vpop.f32.mrb[17].mxu0 }
 0x1e0   : > { %v1018_v43 = vpack.c.bf16 %v488_v42, %v486_v41  ;;  %v490_v44 = vpop.f32.mrb[18].mxu0 }
 0x1e1   : > { %v492_v45 = vpop.f32.mrb[19].mxu0 }
 0x1e2   : > { %798 = vst [vmem:[%s1605_s20 + $0x60] sm:$0xff] %v1018_v43  ;;  %v1020_v46 = vpack.c.bf16 %v492_v45, %v490_v44 }
 0x1e4   : > { %800 = vst [vmem:[%s1605_s20 + $0x6c] sm:$0xff] %v1020_v46 }
 0x1e6   : > { %v496_v47 = vpop.f32.mrb[20].mxu0  ;;  %v1076_v48 = vpop.f32.mrb[8].mxu1 }
 0x1e7   : > { %v1023_v49 = vpack.c.bf16 %v1076_v48, %v1076_v48  ;;  %v498_v50 = vpop.f32.mrb[21].mxu0  ;;  %v591_v51 = vpop.f32.mrb[9].mxu1 }
 0x1e8   : > { %v1022_v52 = vpack.c.bf16 %v498_v50, %v496_v47  ;;  %v1019_v53 = vpack.c.bf16 %v591_v51, %v591_v51  ;;  %v500_v54 = vpop.f32.mrb[22].mxu0  ;;  %v1077_v55 = vpop.f32.mrb[10].mxu1 }
 0x1e9   : > { %803 = vst [vmem:[%s1605_s20 + $0x80] sm:$0xf] %v1023_v49  ;;  %v1025_v56 = vpack.c.bf16 %v1077_v55, %v1077_v55  ;;  %v502_v57 = vpop.f32.mrb[23].mxu0  ;;  %v594_v58 = vpop.f32.mrb[11].mxu1 }
 0x1ea   : > { %802 = vst [vmem:[%s1605_s20 + $0x78] sm:$0xff] %v1022_v52  ;;  %799 = vst [vmem:[%s1605_s20 + $0x68] sm:$0xf] %v1019_v53  ;;  %v1024_v59 = vpack.c.bf16 %v502_v57, %v500_v54  ;;  %v1021_v60 = vpack.c.bf16 %v594_v58, %v594_v58 }
 0x1eb   : > { %805 = vst [vmem:[%s1605_s20 + $0x8c] sm:$0xf] %v1025_v56 }
 0x1ec   : > { %804 = vst [vmem:[%s1605_s20 + $0x84] sm:$0xff] %v1024_v59  ;;  %801 = vst [vmem:[%s1605_s20 + $0x74] sm:$0xf] %v1021_v60 }
 0x1ee   : > { %v506_v61 = vpop.f32.mrb[24].mxu0 }
 0x1ef   : > { %v508_v62 = vpop.f32.mrb[25].mxu0 }
 0x1f0   : > { %v1026_v63 = vpack.c.bf16 %v508_v62, %v506_v61  ;;  %v510_v0 = vpop.f32.mrb[26].mxu0 }
 0x1f1   : > { %v512_v1 = vpop.f32.mrb[27].mxu0 }
 0x1f2   : > { %806 = vst [vmem:[%s1605_s20 + $0x90] sm:$0xff] %v1026_v63  ;;  %v1028_v2 = vpack.c.bf16 %v512_v1, %v510_v0 }
 0x1f4   : > { %808 = vst [vmem:[%s1605_s20 + $0x9c] sm:$0xff] %v1028_v2 }
 0x1f6   : > { %v516_v3 = vpop.f32.mrb[28].mxu0  ;;  %v1080_v4 = vpop.f32.mrb[12].mxu1 }
 0x1f7   : > { %v1031_v5 = vpack.c.bf16 %v1080_v4, %v1080_v4  ;;  %v518_v7 = vpop.f32.mrb[29].mxu0  ;;  %v607_v6 = vpop.f32.mrb[13].mxu1 }
 0x1f8   : > { %v1030_v8 = vpack.c.bf16 %v518_v7, %v516_v3  ;;  %v1027_v9 = vpack.c.bf16 %v607_v6, %v607_v6  ;;  %v520_v10 = vpop.f32.mrb[30].mxu0  ;;  %v1081_v11 = vpop.f32.mrb[14].mxu1 }
 0x1f9   : > { %811 = vst [vmem:[%s1605_s20 + $0xb0] sm:$0xf] %v1031_v5  ;;  %v1033_v12 = vpack.c.bf16 %v1081_v11, %v1081_v11  ;;  %v522_v13 = vpop.f32.mrb[31].mxu0  ;;  %v610_v14 = vpop.f32.mrb[15].mxu1 }
 0x1fa   : > { %810 = vst [vmem:[%s1605_s20 + $0xa8] sm:$0xff] %v1030_v8  ;;  %807 = vst [vmem:[%s1605_s20 + $0x98] sm:$0xf] %v1027_v9  ;;  %v1032_v15 = vpack.c.bf16 %v522_v13, %v520_v10  ;;  %v1029_v16 = vpack.c.bf16 %v610_v14, %v610_v14 }
 0x1fb   : > { %813 = vst [vmem:[%s1605_s20 + $0xbc] sm:$0xf] %v1033_v12 }
 0x1fc   : > { %812 = vst [vmem:[%s1605_s20 + $0xb4] sm:$0xff] %v1032_v15  ;;  %809 = vst [vmem:[%s1605_s20 + $0xa4] sm:$0xf] %v1029_v16 }
 0x1fd   : > { %1285 = shalt.err (!%p1282_p9)
}
 0x1fe   : > { %s1286_s21 = scalar_lea.hbm %s1640_s5, 3072  ;;  %s1290_s19 = scalar_lea.hbm %s1703_s2, 12288 }
 0x1ff   : > { %p1287_p2 = scmp.ne.s32.totalorder %s1640_s5, %s1286_s21  ;;  %p1291_p1 = scmp.lt.u32.totalorder %s1640_s5, %s1703_s2 }
 0x200   : > { %p1292_p4 = scmp.lt.u32.totalorder %s1290_s19, %s1286_s21  ;;  %p1294_p11 = scmp.lt.u32.totalorder %s1286_s21, %s1640_s5 }
 0x201   : > { %p1288_p6 = pnand %p1287_p2, %p1727_p13 }
 0x202   : > { %p1293_p12 = por %p1292_p4, %p1291_p1 }
 0x203   : > { %p1289_p10 = pneg %p1288_p6 }
 0x204   : > { %p1295_p5 = por %p1294_p11, %p1293_p12 }
 0x206   : > { %p1296_p0 = pnand %p1295_p5, %p1289_p10 }
 0x208   : > { %1299 = shalt.err (!%p1296_p0)
}
 0x209   : > { %s1385_s25 = smov 192   ;;  %s1386_s29 = smov 12  }
 0x20a   : > { %1091 = dma.vmem_to_hbm [thread:$0]  (%p1727_p13), %s1642_s8, 3072, %s1640_s5, %s815_s30, %s1385_s25, %s1385_s25, %s1386_s29  }
 0x20b PF: > { %p1108_p3 = scmp.ge.s32.totalorder %s1374_s16, 2  ;;  %s846_s18 = sand.u32 1, %s1346_s9  }
 0x20c   : > { %p1728_p7 = scmp.ne.s32.totalorder %s1716_s24, 0  ;;  %s847_s12 = scalar_lea.sflag [#allocation4], %s846_s18 }
 0x20e   : > { %p1102_p8 = pnand %p1108_p3, %p1728_p7 }
 0x210   : > { %1341 = dma.done.wait (!%p1102_p8), %s847_s12, 3072  }
 0x211   : > { %1343 = vsyncadd (!%p1102_p8), %s847_s12, 4294964224  ;;  %s19_s16 = sadd.s32 1, %s1374_s16   ;;  %s1729_s23 = sld [smem:[#allocation11_spill]] }
 0x212   : > { %p16_p9 = scmp.ge.s32.totalorder %s19_s16, 6   ;;  %s1730_s9 = smov %s1350_s10 }
 0x213   : > { %s1731_s10 = smov %s1354_s11  ;;  %s1732_s11 = smov %s1533_s3 }
 0x214   : > { %s1733_s12 = smov %s1366_s14  ;;  %s1734_s13 = smov %s1370_s15 }
 0x215   : > { %s1736_s15 = smov %s1742_s4  ;;  %18 = sbr.rel (!%p16_p9) target bundleno = 10 (0xa), region = 77 }
 0x217   : > { %s1735_s14 = smov %s1729_s23 }
 0x21c   :  { %852 = vsyncpa [#allocation3], 1 }
 0x21d   :  { %854 = vsyncpa [#allocation3 + $0x1], 1 }
 0x21e   :  { %855 = vsyncpa [#allocation6], 1 }
 0x21f   :  { %856 = vsyncpa [#allocation4], 1 }
 0x220   :  { %858 = vsyncpa [#allocation4 + $0x1], 1 }

</bundles_post_ra>
